<compile_context>
chip_gen: v7x
topology: tpu7x:2x2x1
jax: 0.10.0
libtpu: 0.0.40
codegen_flags: <defaults>
</compile_context>

<pallas_src>
import functools

import jax
import jax.numpy as jnp
from jax.experimental import pallas as pl
from jax.experimental.pallas import tpu as pltpu


_NEG = -1e30          # masked-logit fill for padded class lanes (f32 only)
_MIB = 1024 * 1024


def _round_up(x, m):
    return ((x + m - 1) // m) * m


def _log_softmax_rows(x):
    m = jnp.max(x, axis=-1, keepdims=True)
    z = x - m
    return z - jnp.log(jnp.sum(jnp.exp(z), axis=-1, keepdims=True))


def _sum_all(x):
    """Full reduction to a (1, 1) tile (leading axes first, then 2-D)."""
    while x.ndim > 2:
        x = jnp.sum(x, axis=0)
    return jnp.sum(x, keepdims=True)


def _vmem_limit(est_bytes):
    # TODO(synk): drop the upper cap to ~48 MiB when targeting v7x
    # (64 MiB physical VMEM); v5e/v6e have 128 MiB.
    return int(min(96 * _MIB, max(32 * _MIB, 2 * est_bytes)))


# --------------------------------------------------------------------------
# Call A: fused head kernel — K-tiled teacher-logits matmul + student CE
#         + soft-KL / hard-CE distillation epilogue.
# --------------------------------------------------------------------------

def _head_kernel(labels_ref, s_cls_ref, s_kd_ref, x_ref, w_ref,
                 base_ref, dist_ref, acc_ref,
                 *, num_classes, tau, distill_type):
    k = pl.program_id(0)

    @pl.when(k == 0)
    def _():
        acc_ref[...] = jnp.zeros_like(acc_ref)

    # K-tiled teacher-logits matmul: bf16 MXU operands, f32 accumulation.
    acc_ref[...] += jnp.dot(x_ref[...], w_ref[...],
                            preferred_element_type=jnp.float32)

    @pl.when(k == pl.num_programs(0) - 1)
    def _():
        b, c_pad = s_cls_ref.shape
        lane = jax.lax.broadcasted_iota(jnp.int32, (b, c_pad), 1)
        valid = lane < num_classes

        # ---- student classification cross entropy (mean over batch) ------
        s_cls = jnp.where(valid, s_cls_ref[...].astype(jnp.float32), _NEG)
        logp_cls = _log_softmax_rows(s_cls)
        onehot = (lane == labels_ref[...]).astype(jnp.float32)
        base_ref[...] = -jnp.sum(onehot * logp_cls, keepdims=True) / b

        # ---- distillation against the accumulated teacher logits ---------
        t = jnp.where(valid, acc_ref[...], _NEG)
        s_kd = jnp.where(valid, s_kd_ref[...].astype(jnp.float32), _NEG)
        if distill_type == "soft":
            # F.kl_div(log_softmax(s/T), log_softmax(t/T), 'batchmean',
            #          log_target=True) * T^2
            ls = _log_softmax_rows(s_kd / tau)
            lt = _log_softmax_rows(t / tau)
            dist_ref[...] = (jnp.sum(jnp.exp(lt) * (lt - ls), keepdims=True)
                             * (tau * tau / b))
        else:  # 'hard': CE(student_kd, argmax(teacher)); first-max tie-break
            tmax = jnp.max(t, axis=-1, keepdims=True)
            first_idx = jnp.min(jnp.where(t == tmax, lane, c_pad),
                                axis=-1, keepdims=True)
            onehot_t = (lane == first_idx).astype(jnp.float32)
            logp_kd = _log_softmax_rows(s_kd)
            dist_ref[...] = -jnp.sum(onehot_t * logp_kd, keepdims=True) / b


def fused_head_loss(student_cls, student_kd, labels, x_flat, w_logits,
                    *, num_classes, tau, distill_type, tk=512):
    b, c = student_cls.shape
    feat = x_flat.shape[1]
    c_pad = _round_up(num_classes, 128)
    tk = min(tk, _round_up(feat, 128))       # smaller TK on v7x (64 MiB VMEM)
    feat_pad = _round_up(feat, tk)
    nk = feat_pad // tk

    # Lane / contraction zero-padding (padded rows/cols contribute nothing).
    s_cls = jnp.pad(student_cls, ((0, 0), (0, c_pad - c)))
    s_kd = jnp.pad(student_kd, ((0, 0), (0, c_pad - c)))
    x = jnp.pad(x_flat, ((0, 0), (0, feat_pad - feat))).astype(jnp.bfloat16)
    w = jnp.pad(w_logits.astype(jnp.bfloat16),
                ((0, feat_pad - feat), (0, c_pad - w_logits.shape[1])))
    labels2 = labels.reshape(b, 1).astype(jnp.int32)

    # Weight stream is the HBM-bound part: triple-buffer when K is long.
    if nk >= 3:
        w_spec = pl.BlockSpec((tk, c_pad), lambda k: (k, 0),
                              pipeline_mode=pl.Buffered(3))
        n_wbuf = 3
    else:
        w_spec = pl.BlockSpec((tk, c_pad), lambda k: (k, 0))
        n_wbuf = 2

    est = (n_wbuf * tk * c_pad * 2 + 2 * b * tk * 2
           + 4 * b * c_pad * 4 + b * c_pad * 4 + 256 * 1024)

    kernel = functools.partial(_head_kernel, num_classes=num_classes,
                               tau=float(tau), distill_type=distill_type)
    base, dist = pl.pallas_call(
        kernel,
        out_shape=(jax.ShapeDtypeStruct((1, 1), jnp.float32),
                   jax.ShapeDtypeStruct((1, 1), jnp.float32)),
        grid=(nk,),
        in_specs=[pl.BlockSpec((b, 1), lambda k: (0, 0)),
                  pl.BlockSpec((b, c_pad), lambda k: (0, 0)),
                  pl.BlockSpec((b, c_pad), lambda k: (0, 0)),
                  pl.BlockSpec((b, tk), lambda k: (0, k)),
                  w_spec],
        out_specs=(pl.BlockSpec((1, 1), lambda k: (0, 0)),
                   pl.BlockSpec((1, 1), lambda k: (0, 0))),
        scratch_shapes=[pltpu.VMEM((b, c_pad), jnp.float32)],
        compiler_params=pltpu.CompilerParams(
            dimension_semantics=("arbitrary",),
            vmem_limit_bytes=_vmem_limit(est)),
    )(labels2, s_cls, s_kd, x, w)
    return base[0, 0], dist[0, 0]


# Standalone CE (only used when distillation_type == 'none').
def _ce_kernel(labels_ref, logits_ref, out_ref, *, num_classes):
    b, c_pad = logits_ref.shape
    lane = jax.lax.broadcasted_iota(jnp.int32, (b, c_pad), 1)
    logits = jnp.where(lane < num_classes,
                       logits_ref[...].astype(jnp.float32), _NEG)
    logp = _log_softmax_rows(logits)
    onehot = (lane == labels_ref[...]).astype(jnp.float32)
    out_ref[...] = -jnp.sum(onehot * logp, keepdims=True) / b


def pallas_cross_entropy(logits, labels, num_classes):
    b, c = logits.shape
    c_pad = _round_up(num_classes, 128)
    lp = jnp.pad(logits, ((0, 0), (0, c_pad - c)))
    labels2 = labels.reshape(b, 1).astype(jnp.int32)
    out = pl.pallas_call(
        functools.partial(_ce_kernel, num_classes=num_classes),
        out_shape=jax.ShapeDtypeStruct((1, 1), jnp.float32),
        grid=(1,),
        in_specs=[pl.BlockSpec((b, 1), lambda i: (0, 0)),
                  pl.BlockSpec((b, c_pad), lambda i: (0, 0))],
        out_specs=pl.BlockSpec((1, 1), lambda i: (0, 0)),
    )(labels2, lp)
    return out[0, 0]


# --------------------------------------------------------------------------
# Call B: manifold kernel — grid over hidden stages, per-stage partial
#         intra / inter / random terms (summed in the wrapper).
# --------------------------------------------------------------------------

def _manifold_kernel(p_ref, x_ref, w_ref, sel_ref,
                     intra_ref, inter_ref, rand_ref, *, n_true):
    f32 = jnp.float32
    b, n_pad, d = p_ref.shape
    p = p_ref[...].astype(f32)                                # (B, Np, D)

    # Teacher patches: one flat (B*Np, PF) @ (PF, D) bf16 MXU matmul,
    # f32 accumulation, then split the leading dim (sublane-aligned).
    t = jnp.dot(x_ref[...], w_ref[...],
                preferred_element_type=f32).reshape(b, n_pad, d)

    # Frobenius normalization folded into scalar factors:
    #   Gram(F/||F||) = Gram(F) / ||F||^2 ; (F/||F||) = F * rsqrt(||F||^2).
    n1sq = _sum_all(p * p)                                    # (1, 1)
    n2sq = _sum_all(t * t)
    inv1, inv2 = 1.0 / n1sq, 1.0 / n2sq
    rs1, rs2 = jax.lax.rsqrt(n1sq), jax.lax.rsqrt(n2sq)

    # intra: per-sample (Np, Np) Grams.
    g1 = jnp.einsum('bnd,bmd->bnm', p, p, preferred_element_type=f32)
    g2 = jnp.einsum('bnd,bmd->bnm', t, t, preferred_element_type=f32)
    dg = g1 * inv1 - g2 * inv2
    intra_ref[...] = _sum_all(dg * dg) / b

    # inter: per-patch-index (B, B) Grams; the layout swap rides the XLU.
    pn = pltpu.einshape('bnd->nbd', p)
    tn = pltpu.einshape('bnd->nbd', t)
    h1 = jnp.einsum('nbd,ncd->nbc', pn, pn, preferred_element_type=f32)
    h2 = jnp.einsum('nbd,ncd->nbc', tn, tn, preferred_element_type=f32)
    dh = h1 * inv1 - h2 * inv2
    inter_ref[...] = _sum_all(dh * dh) / n_true

    # random: lane-dense (B, Np) 0/1 mask times rowsum_d(diff^2).
    diff = p * rs1 - t * rs2
    d2 = jnp.sum(diff * diff, axis=-1)                        # (B, Np)
    rand_ref[...] = jnp.sum(sel_ref[...] * d2, keepdims=True)


def pallas_manifold_sums(p_stack, x_patches, w_stack, sel_stack, *, n_true):
    s, b, n_pad, d = p_stack.shape
    bn, pf = x_patches.shape

    est = (2 * b * n_pad * d * 4 + 2 * bn * pf * 2 + 2 * pf * d * 2
           + 2 * b * n_pad * 4 + bn * d * 4
           + 3 * b * n_pad * n_pad * 4 + 3 * n_pad * b * b * 4
           + 2 * b * n_pad * d * 4 + 256 * 1024)

    out_spec = pl.BlockSpec((None, 1, 1), lambda i: (i, 0, 0))
    intra, inter, rnd = pl.pallas_call(
        functools.partial(_manifold_kernel, n_true=n_true),
        out_shape=(jax.ShapeDtypeStruct((s, 1, 1), jnp.float32),) * 3,
        grid=(s,),
        in_specs=[
            pl.BlockSpec((None, b, n_pad, d), lambda i: (i, 0, 0, 0)),
            pl.BlockSpec((bn, pf), lambda i: (0, 0)),
            pl.BlockSpec((None, pf, d), lambda i: (i, 0, 0)),
            pl.BlockSpec((None, b, n_pad), lambda i: (i, 0, 0)),
        ],
        out_specs=(out_spec, out_spec, out_spec),
        compiler_params=pltpu.CompilerParams(
            dimension_semantics=("parallel",),     # megacore on v7x
            vmem_limit_bytes=_vmem_limit(est)),
    )(p_stack, x_patches, w_stack, sel_stack)
    # per-stage partials -> totals (sum of constants commutes with lambdas)
    return jnp.sum(intra), jnp.sum(inter), jnp.sum(rnd)


# --------------------------------------------------------------------------
# Loss module
# --------------------------------------------------------------------------

class PallasLoss:
    """JAX/Pallas port of the PyTorch distillation `Loss` module."""

    def __init__(self, teacher_params, distillation_type, tau,
                 lamda_cls, lamda_distill, lamda_patch,
                 hidden_stages, lambda_intra, lambda_inter, lambda_random,
                 num_classes, rng_key):
        assert distillation_type in ("none", "soft", "hard")
        self.tp = teacher_params
        self.distillation_type = distillation_type
        self.tau = tau
        self.lamda_cls = lamda_cls
        self.lamda_distill = lamda_distill
        self.lamda_patch = lamda_patch
        self.hidden_stages = hidden_stages
        self.lambda_intra = lambda_intra
        self.lambda_inter = lambda_inter
        self.lambda_random = lambda_random
        self.num_classes = num_classes
        self.rng_key = rng_key

    def _rand_mask(self, stage_idx, bn):
        # torch.randperm(B*N)[:192] -> order-invariant 0/1 row-selection mask.
        # TODO(synk): torch re-randomizes every forward call; this mask is
        # deterministic per (rng_key, stage_idx).
        k = min(192, bn)
        perm = jax.random.permutation(
            jax.random.fold_in(self.rng_key, stage_idx), bn)
        return jnp.zeros((bn,), jnp.float32).at[perm[:k]].set(1.0)

    def forward(self, samples, model_id, logits, patches, labels):
        logits1 = logits[model_id]
        logits1_kd = None
        if isinstance(logits1, (tuple, list)):
            logits1, logits1_kd = logits1
        patch1 = patches[model_id]

        b = logits1.shape[0]
        c = self.num_classes

        if self.distillation_type == "none":
            return pallas_cross_entropy(logits1, labels, c)

        # ---- fused: teacher logits + base CE + distillation (1 call) -----
        student_kd = logits1_kd if logits1_kd is not None else logits1
        x_flat = samples.reshape(b, -1)
        base_loss, distillation_loss = fused_head_loss(
            logits1, student_kd, labels, x_flat, self.tp["w_logits"],
            num_classes=c, tau=self.tau,
            distill_type=self.distillation_type)

        # ---- manifold / patch loss: all hidden stages in one call --------
        if self.hidden_stages:
            n = self.tp["n_patch"]
            n_pad = _round_up(n, 8)           # sublane-aligned patch count
            pf = x_flat.shape[1] // n

            def pad_n(t):  # zero-pad the patch axis; padded rows are inert
                return jnp.pad(
                    t, ((0, 0), (0, n_pad - n)) + ((0, 0),) * (t.ndim - 2))

            x_patches = pad_n(x_flat.reshape(b, n, pf)) \
                .reshape(b * n_pad, pf).astype(jnp.bfloat16)
            p_stack = jnp.stack([pad_n(patch1[i])
                                 for (i, _) in self.hidden_stages])
            w_stack = jnp.stack([self.tp["w_patch"][j].astype(jnp.bfloat16)
                                 for (_, j) in self.hidden_stages])
            sel_stack = jnp.stack([
                jnp.pad(self._rand_mask(idx, b * n).reshape(b, n),
                        ((0, 0), (0, n_pad - n)))
                for idx in range(len(self.hidden_stages))])

            intra, inter, rnd = pallas_manifold_sums(
                p_stack, x_patches, w_stack, sel_stack, n_true=n)
            patch_loss = (self.lambda_intra * intra +
                          self.lambda_inter * inter +
                          self.lambda_random * rnd)
        else:
            patch_loss = jnp.float32(0.0)

        loss = (self.lamda_cls * base_loss +
                self.lamda_distill * distillation_loss +
                self.lamda_patch * patch_loss)
        return loss, base_loss, distillation_loss, patch_loss


# --------------------------------------------------------------------------
# demo / smoke test
# --------------------------------------------------------------------------

if __name__ == "__main__":
    key = jax.random.PRNGKey(0)
    keys = jax.random.split(key, 10)

    B, C, H, W = 2, 4, 16, 16          # samples (NCHW)
    NUM_CLASSES = 10
    N_PATCH, D_PATCH = 8, 32           # (B, N, D) hidden-stage patches

    samples = jax.random.normal(keys[0], (B, C, H, W), jnp.float32)
    logits_cls = jax.random.normal(keys[1], (B, NUM_CLASSES), jnp.float32)
    logits_kd = jax.random.normal(keys[2], (B, NUM_CLASSES), jnp.float32)
    patches_s0 = jax.random.normal(keys[3], (B, N_PATCH, D_PATCH), jnp.float32)
    patches_s1 = jax.random.normal(keys[4], (B, N_PATCH, D_PATCH), jnp.float32)
    labels = jax.random.randint(keys[5], (B,), 0, NUM_CLASSES)

    feat = C * H * W                   # 1024 -> 2 K-tiles of 512 in the head
    patch_feat = feat // N_PATCH       # 128
    # TODO(synk): the real teacher is an arbitrary nn.Module; here it is a
    # synthetic linear teacher whose matmuls run inside the Pallas kernels.
    teacher_params = {
        "w_logits": (0.02 * jax.random.normal(
            keys[6], (feat, NUM_CLASSES), jnp.float32)).astype(jnp.bfloat16),
        "w_patch": [
            (0.02 * jax.random.normal(
                keys[7], (patch_feat, D_PATCH), jnp.float32)).astype(jnp.bfloat16),
            (0.02 * jax.random.normal(
                keys[8], (patch_feat, D_PATCH), jnp.float32)).astype(jnp.bfloat16),
        ],
        "n_patch": N_PATCH,
    }

    loss_mod = PallasLoss(
        teacher_params=teacher_params,
        distillation_type="soft",
        tau=2.0,
        lamda_cls=1.0,
        lamda_distill=0.5,
        lamda_patch=0.5,
        hidden_stages=[(0, 0), (1, 1)],
        lambda_intra=1.0,
        lambda_inter=1.0,
        lambda_random=0.1,
        num_classes=NUM_CLASSES,
        rng_key=keys[9],
    )

    logits = [(logits_cls, logits_kd)]     # student: (cls head, distill head)
    patches = [[patches_s0, patches_s1]]   # student hidden-stage patches
    model_id = 0

    out = loss_mod.forward(samples, model_id, logits, patches, labels)
    out = jax.block_until_ready(out)
    loss, base_loss, distill_loss, patch_loss = out
    assert all(jnp.isfinite(jnp.asarray(v)) for v in out)
    print("KERNEL_OK")
</pallas_src>

<mosaic_0001>
module attributes {stable_mosaic.version = 11 : i64} {
  func.func @_head_kernel(%arg0: i32, %arg1: memref<2x1xi32, #tpu.memory_space<vmem>>, %arg2: memref<2x128xf32, #tpu.memory_space<vmem>>, %arg3: memref<2x128xf32, #tpu.memory_space<vmem>>, %arg4: memref<2x512xbf16, #tpu.memory_space<vmem>>, %arg5: memref<512x128xbf16, #tpu.memory_space<vmem>>, %arg6: memref<1x1xf32, #tpu.memory_space<vmem>>, %arg7: memref<1x1xf32, #tpu.memory_space<vmem>>, %arg8: memref<2x128xf32, #tpu.memory_space<vmem>>) attributes {dimension_semantics = [#tpu.dimension_semantics<arbitrary>], iteration_bounds = array<i64: 2>, scalar_prefetch = 0 : i64, scratch_operands = 1 : i64, tpu.core_type = #tpu.core_type<tc>, window_params = [{pipeline_mode = #tpu.pipeline_mode<synchronous>, transform_indices = @transform_0, window_bounds = array<i64: 2, 1>}, {pipeline_mode = #tpu.pipeline_mode<synchronous>, transform_indices = @transform_1, window_bounds = array<i64: 2, 128>}, {pipeline_mode = #tpu.pipeline_mode<synchronous>, transform_indices = @transform_2, window_bounds = array<i64: 2, 128>}, {transform_indices = @transform_3, window_bounds = array<i64: 2, 512>}, {transform_indices = @transform_4, window_bounds = array<i64: 512, 128>}, {pipeline_mode = #tpu.pipeline_mode<synchronous>, transform_indices = @transform_5, window_bounds = array<i64: 1, 1>}, {pipeline_mode = #tpu.pipeline_mode<synchronous>, transform_indices = @transform_6, window_bounds = array<i64: 1, 1>}]} {
    %c0_i32 = arith.constant 0 : i32
    %0 = arith.cmpi eq, %arg0, %c0_i32 : i32
    %1 = arith.extui %0 : i1 to i32
    %c0_i32_0 = arith.constant 0 : i32
    %2 = arith.cmpi ne, %1, %c0_i32_0 : i32
    scf.if %2 {
      %cst_9 = arith.constant 0.000000e+00 : f32
      %12 = vector.broadcast %cst_9 : f32 to vector<2x128xf32>
      %c0_10 = arith.constant 0 : index
      %c0_11 = arith.constant 0 : index
      %13 = vector.load %arg8[%c0_10, %c0_11] : memref<2x128xf32, #tpu.memory_space<vmem>>, vector<2x128xf32>
      tpu.vector_store %arg8[%c0_10, %c0_11], %12 {strides = array<i32>} : memref<2x128xf32, #tpu.memory_space<vmem>>, vector<2x128xf32>,
    } else {
    }
    %c0 = arith.constant 0 : index
    %c0_1 = arith.constant 0 : index
    %3 = vector.load %arg8[%c0, %c0_1] : memref<2x128xf32, #tpu.memory_space<vmem>>, vector<2x128xf32>
    %c0_2 = arith.constant 0 : index
    %c0_3 = arith.constant 0 : index
    %4 = vector.load %arg4[%c0_2, %c0_3] : memref<2x512xbf16, #tpu.memory_space<vmem>>, vector<2x512xbf16>
    %c0_4 = arith.constant 0 : index
    %c0_5 = arith.constant 0 : index
    %5 = vector.load %arg5[%c0_4, %c0_5] : memref<512x128xbf16, #tpu.memory_space<vmem>>, vector<512x128xbf16>
    %cst = arith.constant dense<0.000000e+00> : vector<2x128xf32>
    %6 = tpu.matmul %4, %5, %cst {dimension_numbers = #tpu.dot_dimension_numbers<[1], [0], [0], [1], [0, 0, 1, 1], [], []>} : vector<2x512xbf16>, vector<512x128xbf16>, vector<2x128xf32> -> vector<2x128xf32>
    %7 = arith.addf %3, %6 : vector<2x128xf32>
    %c0_6 = arith.constant 0 : index
    %c0_7 = arith.constant 0 : index
    %8 = vector.load %arg8[%c0_6, %c0_7] : memref<2x128xf32, #tpu.memory_space<vmem>>, vector<2x128xf32>
    tpu.vector_store %arg8[%c0_6, %c0_7], %7 {strides = array<i32>} : memref<2x128xf32, #tpu.memory_space<vmem>>, vector<2x128xf32>,
    %c1_i32 = arith.constant 1 : i32
    %9 = arith.cmpi eq, %arg0, %c1_i32 : i32
    %10 = arith.extui %9 : i1 to i32
    %c0_i32_8 = arith.constant 0 : i32
    %11 = arith.cmpi ne, %10, %c0_i32_8 : i32
    scf.if %11 {
      %12 = tpu.iota {dimensions = array<i32: 1>} : vector<2x128xi32>
      %c10_i32 = arith.constant 10 : i32
      %13 = vector.broadcast %c10_i32 : i32 to vector<2x128xi32>
      %14 = arith.cmpi slt, %12, %13 : vector<2x128xi32>
      %c0_9 = arith.constant 0 : index
      %c0_10 = arith.constant 0 : index
      %15 = vector.load %arg2[%c0_9, %c0_10] : memref<2x128xf32, #tpu.memory_space<vmem>>, vector<2x128xf32>
      %cst_11 = arith.constant -1.000000e+30 : f32
      %16 = vector.broadcast %cst_11 : f32 to vector<2x128xf32>
      %17 = arith.select %14, %15, %16 : vector<2x128xi1>, vector<2x128xf32>
      %cst_12 = arith.constant dense<0xFF800000> : vector<2xf32>
      %18 = vector.multi_reduction <maximumf>, %17, %cst_12 [1] : vector<2x128xf32> to vector<2xf32>
      %19 = vector.shape_cast %18 : vector<2xf32> to vector<2x1xf32>
      %20 = vector.broadcast %19 : vector<2x1xf32> to vector<2x128xf32>
      %21 = arith.subf %17, %20 : vector<2x128xf32>
      %22 = math.exp %21 : vector<2x128xf32>
      %cst_13 = arith.constant dense<0.000000e+00> : vector<2xf32>
      %23 = vector.multi_reduction <add>, %22, %cst_13 [1] : vector<2x128xf32> to vector<2xf32>
      %24 = vector.shape_cast %23 : vector<2xf32> to vector<2x1xf32>
      %25 = math.log %24 : vector<2x1xf32>
      %26 = vector.broadcast %25 : vector<2x1xf32> to vector<2x128xf32>
      %27 = arith.subf %21, %26 : vector<2x128xf32>
      %c0_14 = arith.constant 0 : index
      %c0_15 = arith.constant 0 : index
      %28 = vector.load %arg1[%c0_14, %c0_15] : memref<2x1xi32, #tpu.memory_space<vmem>>, vector<2x1xi32>
      %29 = vector.broadcast %28 : vector<2x1xi32> to vector<2x128xi32>
      %30 = arith.cmpi eq, %12, %29 : vector<2x128xi32>
      %31 = arith.extui %30 : vector<2x128xi1> to vector<2x128xi32>
      %32 = arith.sitofp %31 : vector<2x128xi32> to vector<2x128xf32>
      %33 = arith.mulf %32, %27 : vector<2x128xf32>
      %34 = vector.shape_cast %33 : vector<2x128xf32> to vector<1x2x128xf32>
      %cst_16 = arith.constant dense<0.000000e+00> : vector<1xf32>
      %35 = vector.multi_reduction <add>, %34, %cst_16 [1, 2] : vector<1x2x128xf32> to vector<1xf32>
      %36 = vector.shape_cast %35 : vector<1xf32> to vector<1x1x1xf32>
      %37 = vector.extract %36[0, 0, 0] : f32 from vector<1x1x1xf32>
      %38 = vector.broadcast %37 : f32 to vector<1x1xf32>
      %cst_17 = arith.constant 0.000000e+00 : f32
      %39 = vector.broadcast %cst_17 : f32 to vector<1x1xf32>
      %40 = arith.subf %39, %38 : vector<1x1xf32>
      %cst_18 = arith.constant 2.000000e+00 : f32
      %41 = vector.broadcast %cst_18 : f32 to vector<1x1xf32>
      %42 = arith.divf %40, %41 : vector<1x1xf32>
      %c0_19 = arith.constant 0 : index
      %c0_20 = arith.constant 0 : index
      %43 = vector.load %arg6[%c0_19, %c0_20] : memref<1x1xf32, #tpu.memory_space<vmem>>, vector<1x1xf32>
      tpu.vector_store %arg6[%c0_19, %c0_20], %42 {strides = array<i32>} : memref<1x1xf32, #tpu.memory_space<vmem>>, vector<1x1xf32>,
      %c0_21 = arith.constant 0 : index
      %c0_22 = arith.constant 0 : index
      %44 = vector.load %arg8[%c0_21, %c0_22] : memref<2x128xf32, #tpu.memory_space<vmem>>, vector<2x128xf32>
      %cst_23 = arith.constant -1.000000e+30 : f32
      %45 = vector.broadcast %cst_23 : f32 to vector<2x128xf32>
      %46 = arith.select %14, %44, %45 : vector<2x128xi1>, vector<2x128xf32>
      %c0_24 = arith.constant 0 : index
      %c0_25 = arith.constant 0 : index
      %47 = vector.load %arg3[%c0_24, %c0_25] : memref<2x128xf32, #tpu.memory_space<vmem>>, vector<2x128xf32>
      %cst_26 = arith.constant -1.000000e+30 : f32
      %48 = vector.broadcast %cst_26 : f32 to vector<2x128xf32>
      %49 = arith.select %14, %47, %48 : vector<2x128xi1>, vector<2x128xf32>
      %cst_27 = arith.constant 2.000000e+00 : f32
      %50 = vector.broadcast %cst_27 : f32 to vector<2x128xf32>
      %51 = arith.divf %49, %50 : vector<2x128xf32>
      %cst_28 = arith.constant dense<0xFF800000> : vector<2xf32>
      %52 = vector.multi_reduction <maximumf>, %51, %cst_28 [1] : vector<2x128xf32> to vector<2xf32>
      %53 = vector.shape_cast %52 : vector<2xf32> to vector<2x1xf32>
      %54 = vector.broadcast %53 : vector<2x1xf32> to vector<2x128xf32>
      %55 = arith.subf %51, %54 : vector<2x128xf32>
      %56 = math.exp %55 : vector<2x128xf32>
      %cst_29 = arith.constant dense<0.000000e+00> : vector<2xf32>
      %57 = vector.multi_reduction <add>, %56, %cst_29 [1] : vector<2x128xf32> to vector<2xf32>
      %58 = vector.shape_cast %57 : vector<2xf32> to vector<2x1xf32>
      %59 = math.log %58 : vector<2x1xf32>
      %60 = vector.broadcast %59 : vector<2x1xf32> to vector<2x128xf32>
      %61 = arith.subf %55, %60 : vector<2x128xf32>
      %cst_30 = arith.constant 2.000000e+00 : f32
      %62 = vector.broadcast %cst_30 : f32 to vector<2x128xf32>
      %63 = arith.divf %46, %62 : vector<2x128xf32>
      %cst_31 = arith.constant dense<0xFF800000> : vector<2xf32>
      %64 = vector.multi_reduction <maximumf>, %63, %cst_31 [1] : vector<2x128xf32> to vector<2xf32>
      %65 = vector.shape_cast %64 : vector<2xf32> to vector<2x1xf32>
      %66 = vector.broadcast %65 : vector<2x1xf32> to vector<2x128xf32>
      %67 = arith.subf %63, %66 : vector<2x128xf32>
      %68 = math.exp %67 : vector<2x128xf32>
      %cst_32 = arith.constant dense<0.000000e+00> : vector<2xf32>
      %69 = vector.multi_reduction <add>, %68, %cst_32 [1] : vector<2x128xf32> to vector<2xf32>
      %70 = vector.shape_cast %69 : vector<2xf32> to vector<2x1xf32>
      %71 = math.log %70 : vector<2x1xf32>
      %72 = vector.broadcast %71 : vector<2x1xf32> to vector<2x128xf32>
      %73 = arith.subf %67, %72 : vector<2x128xf32>
      %74 = math.exp %73 : vector<2x128xf32>
      %75 = arith.subf %73, %61 : vector<2x128xf32>
      %76 = arith.mulf %74, %75 : vector<2x128xf32>
      %77 = vector.shape_cast %76 : vector<2x128xf32> to vector<1x2x128xf32>
      %cst_33 = arith.constant dense<0.000000e+00> : vector<1xf32>
      %78 = vector.multi_reduction <add>, %77, %cst_33 [1, 2] : vector<1x2x128xf32> to vector<1xf32>
      %79 = vector.shape_cast %78 : vector<1xf32> to vector<1x1x1xf32>
      %80 = vector.extract %79[0, 0, 0] : f32 from vector<1x1x1xf32>
      %81 = vector.broadcast %80 : f32 to vector<1x1xf32>
      %cst_34 = arith.constant 2.000000e+00 : f32
      %82 = vector.broadcast %cst_34 : f32 to vector<1x1xf32>
      %83 = arith.mulf %81, %82 : vector<1x1xf32>
      %c0_35 = arith.constant 0 : index
      %c0_36 = arith.constant 0 : index
      %84 = vector.load %arg7[%c0_35, %c0_36] : memref<1x1xf32, #tpu.memory_space<vmem>>, vector<1x1xf32>
      tpu.vector_store %arg7[%c0_35, %c0_36], %83 {strides = array<i32>} : memref<1x1xf32, #tpu.memory_space<vmem>>, vector<1x1xf32>,
    } else {
    }
    return
  }
  func.func @transform_0(%arg0: i32) -> (i32, i32) {
    %c0_i32 = arith.constant 0 : i32
    %c0_i32_0 = arith.constant 0 : i32
    %c0_i32_1 = arith.constant 0 : i32
    return %c0_i32, %c0_i32_0 : i32, i32
  }
  func.func @transform_1(%arg0: i32) -> (i32, i32) {
    %c0_i32 = arith.constant 0 : i32
    %c0_i32_0 = arith.constant 0 : i32
    %c0_i32_1 = arith.constant 0 : i32
    return %c0_i32, %c0_i32_0 : i32, i32
  }
  func.func @transform_2(%arg0: i32) -> (i32, i32) {
    %c0_i32 = arith.constant 0 : i32
    %c0_i32_0 = arith.constant 0 : i32
    %c0_i32_1 = arith.constant 0 : i32
    return %c0_i32, %c0_i32_0 : i32, i32
  }
  func.func @transform_3(%arg0: i32) -> (i32, i32) {
    %c0_i32 = arith.constant 0 : i32
    %c0_i32_0 = arith.constant 0 : i32
    return %c0_i32, %arg0 : i32, i32
  }
  func.func @transform_4(%arg0: i32) -> (i32, i32) {
    %c0_i32 = arith.constant 0 : i32
    %c0_i32_0 = arith.constant 0 : i32
    return %arg0, %c0_i32 : i32, i32
  }
  func.func @transform_5(%arg0: i32) -> (i32, i32) {
    %c0_i32 = arith.constant 0 : i32
    %c0_i32_0 = arith.constant 0 : i32
    %c0_i32_1 = arith.constant 0 : i32
    return %c0_i32, %c0_i32_0 : i32, i32
  }
  func.func @transform_6(%arg0: i32) -> (i32, i32) {
    %c0_i32 = arith.constant 0 : i32
    %c0_i32_0 = arith.constant 0 : i32
    %c0_i32_1 = arith.constant 0 : i32
    return %c0_i32, %c0_i32_0 : i32, i32
  }
}

</mosaic_0001>

<bundles_post_ra>
// kernel: tpu_custom_call.1
= control target key start
LH: loop header
LB: loop body
LE: loop exit
PB: predicated region body
PF: predicated region fallthrough
CT: control target
= control target key end

     0   :  { %12 = vsyncpa [#allocation4], 0  ;;  %s1422_s0 = inlined_call_operand.vmem [shape: s32[2,1], index: 0, kind: input, shape index: {}]   ;;  %s1423_s1 = inlined_call_operand.vmem [shape: f32[2,128], index: 1, kind: input, shape index: {}]   ;;  %s1424_s2 = inlined_call_operand.vmem [shape: f32[2,128], index: 2, kind: input, shape index: {}]   ;;  %s1425_s3 = inlined_call_operand.vmem [shape: bf16[2,1024], index: 3, kind: input, shape index: {}]   ;;  %s1426_s4 = inlined_call_operand.hbm [shape: bf16[1024,128], index: 4, kind: input, shape index: {}]   ;;  %s1427_s5 = inlined_call_operand.hbm [shape: f32[1,1], index: 5, kind: output, shape index: {0}]   ;;  %s1428_s6 = inlined_call_operand.hbm [shape: f32[1,1], index: 6, kind: output, shape index: {1}]  }
   0x1   :  { %14 = vsyncpa [#allocation4 + $0x1], 0 }
   0x2   :  { %15 = vsyncpa [#allocation5], 0 }
   0x3   :  { %16 = vsyncpa [#allocation8], 0  ;;  %s1209_s21 = smov 0   ;;  %s1211_s22 = smov 0  }
   0x4   :  { %s1213_s23 = smov 0   ;;  %s1215_s24 = smov 0  }
   0x5 LB: > { %s1228_s25 = sadd.s32 4294967295, %s1163_s24   ;;  %s1231_s26 = sadd.s32 1, %s1163_s24   ;;  %s1163_s24 = sphi %s1215_s24, %s1435_s24   ;;  %s1159_s23 = sphi %s1213_s23, %s1434_s23   ;;  %s1155_s22 = sphi %s1211_s22, %s1433_s22   ;;  %s1151_s21 = sphi %s1209_s21, %s1432_s21  }
   0x6   : > { %s115_s27 = ssub.s32 %s1163_s24, %s1231_s26  ;;  %s118_s28 = sadd.s32 1, %s1159_s23 }
   0x7   : > { %p116_p0 = scmp.eq.s32.totalorder %s115_s27, 0  ;;  %p125_p1 = scmp.ne.s32.totalorder %s1159_s23, %s1155_s22 }
   0x8   : > { %p126_p2 = scmp.eq.s32.totalorder %s1163_s24, 0  ;;  %p131_p3 = scmp.ne.s32.totalorder %s1155_s22, %s1151_s21 }
   0x9   : > { %s1241_s29 = scalar_select %p116_p0, %s1159_s23, %s118_s28  }
   0xa   : > { %p127_p4 = por %p126_p2, %p125_p1  ;;  %p132_p5 = scmp.eq.s32.totalorder %s1228_s25, 0 }
   0xb   : > { %p947_p6 = scmp.lt.s32.totalorder %s1163_s24, 2  ;;  %s214_s7 = sand.u32 1, %s1159_s23  }
   0xc   : > { %p1245_p7 = por %p132_p5, %p131_p3  ;;  %s836_s8 = sshll.u32 %s214_s7, 8 }
   0xd   : > { %s884_s9 = sshll.u32 %s1163_s24, 12  ;;  %s218_s13 = scalar_lea.vmem [#allocation3], %s836_s8 }
   0xe   : > { %s1254_s12 = scalar_lea.hbm %s1426_s4, %s884_s9  ;;  %s225_s14 = sshll.u32 %s218_s13, 4  ;;  %s1256_s14 = int_to_ptr.vmem [resolvable:$true] %s225_s14 }
   0xf   : > { %p1258_p8 = pnand %p947_p6, %p127_p4  ;;  %s1263_s16 = scalar_lea.sflag [#allocation4], %s214_s7 }
  0x10   : > { %s1039_s17 = scalar_lea.hbm %s1254_s12, 4096  ;;  %s1044_s20 = scalar_lea.hbm %s1426_s4, 8192 }
  0x11   : > { %p1040_p10 = scmp.ne.s32.totalorder %s1254_s12, %s1039_s17  ;;  %p1041_p11 = pneg %p1258_p8 }
  0x12   : > { %p1045_p0 = scmp.lt.u32.totalorder %s1254_s12, %s1426_s4  ;;  %p1046_p1 = scmp.lt.u32.totalorder %s1044_s20, %s1039_s17 }
  0x13   : > { %p1042_p12 = pnand %p1041_p11, %p1040_p10  ;;  %p1048_p3 = scmp.lt.u32.totalorder %s1039_s17, %s1254_s12 }
  0x14   : > { %p1047_p2 = por %p1046_p1, %p1045_p0 }
  0x15   : > { %p1043_p13 = pneg %p1042_p12 }
  0x16   : > { %p1049_p4 = por %p1048_p3, %p1047_p2 }
  0x18   : > { %p1050_p5 = pnand %p1049_p4, %p1043_p13 }
  0x1a   : > { %1053 = shalt.err (!%p1050_p5)
}
  0x1b   : > { %s1054_s28 = scalar_lea.vmem %s1256_s14, 4096  ;;  %s1165_s7 = smov [#allocation3]  }
  0x1c   : > { %p1055_p6 = scmp.ne.s32.totalorder %s1256_s14, %s1054_s28  ;;  %s1059_s8 = sshll.u32 %s1165_s7, 4  ;;  %s1060_s8 = int_to_ptr.vmem [resolvable:$false] %s1059_s8 }
  0x1d   : > { %s1061_s9 = scalar_lea.vmem %s1060_s8, 8192  ;;  %p1062_p9 = scmp.lt.s32.totalorder %s1256_s14, %s1060_s8 }
  0x1e   : > { %p1057_p10 = pnand %p1055_p6, %p1041_p11  ;;  %p1063_p0 = scmp.lt.s32.totalorder %s1061_s9, %s1054_s28 }
  0x20   : > { %p1058_p12 = pneg %p1057_p10  ;;  %p1064_p1 = por %p1063_p0, %p1062_p9 }
  0x22   : > { %p1065_p2 = pnand %p1064_p1, %p1058_p12 }
  0x24   : > { %1068 = shalt.err (!%p1065_p2)
}
  0x25   : > { %s1166_s10 = smov 64   ;;  %s1167_s11 = smov 4  }
  0x26   : > { %946 = dma.hbm_to_vmem [thread:$0]  (!%p1258_p8), %s1254_s12, 4096, %s1256_s14, %s1263_s16, %s1166_s10, %s1166_s10, %s1167_s11  }
  0x27   : > { %p233_p11 = scmp.lt.s32.totalorder %s1163_s24, 3  ;;  %p1431_p13 = scmp.ge.s32.totalorder %s1163_s24, 1 }
  0x29   : > { %p234_p3 = pnand %p1431_p13, %p233_p11 }
  0x2a   : > { %s239_s13 = sand.u32 (!%p234_p3), 1, %s1155_s22  }
  0x2b   : > { %237 = sbr.rel (%p234_p3) target bundleno = 913 (0x391), region = 40  ;;  %s840_s17 = sshll.u32 (!%p234_p3), %s239_s13, 8 }
  0x2c   : > { %s240_s18 = scalar_lea.sflag (!%p234_p3), [#allocation4], %s239_s13  ;;  %s1295_s19 = scalar_lea.vmem (!%p234_p3), [#allocation3], %s840_s17 }
  0x32   : > { %1138 = dma.done.wait (%p1245_p7), %s240_s18, 4096  }
  0x33   : > { %1140 = vsyncadd (%p1245_p7), %s240_s18, 4294963200  ;;  %s841_s20 = sshll.u32 %s1228_s25, 2  ;;  %p842_p8 = scmp.ne.s32.totalorder %s1228_s25, 0 }
  0x34   : > { %p272_p9 = scmp.lt.s32.totalorder %s841_s20, 7  ;;  %v1168_v0 = vmov (!%p842_p8), 0.0  }
  0x35   : > { %281 = sbr.rel (%p842_p8) target bundleno = 60 (0x3c), region = 48  ;;  %282 = vst [vmem:[#allocation2] sm:$0x3] (!%p842_p8), %v1168_v0 }
  0x36   : > { %s1437_s20 = smov (!%p272_p9, %s841_s20), 7 }
  0x37   : > { %s274_s14 = scalar_lea.vmem %s1425_s3, %s1437_s20 }
  0x3c PF: > { %v992_v1 = vld [vmem:[%s1295_s19 + $0x40] sm:$0xff]   ;;  %v996_v5 = vld [vmem:[%s1295_s19 + $0x48] sm:$0xff]   ;;  %v1000_v9 = vld [vmem:[%s1295_s19 + $0x50] sm:$0xff]   ;;  %v361_v31 = vlaneseq  ;;  %v1169_v35 = vmov 1966171168   ;;  %p876_p7 = scmp.ne.s32.totalorder %s1228_s25, 1 }
  0x3d   : > { %v993_v2 = vld [vmem:[%s1295_s19 + $0xc0] sm:$0xff]   ;;  %885 = vmatprep.subr.bf16.mxu0 %v992_v1  ;;  %v997_v6 = vld [vmem:[%s1295_s19 + $0xc8] sm:$0xff]   ;;  %v1001_v10 = vld [vmem:[%s1295_s19 + $0xd0] sm:$0xff]   ;;  %v359_v36 = vunpack.c.l.s4 %v1169_v35  ;;  %vm661_vm1 = vcmask (!%p876_p7), 1041408   ;;  %vm696_vm3 = vcmask (!%p876_p7), 0  }
  0x3e   : > { %v994_v3 = vld [vmem:[%s1295_s19] sm:$0xff]   ;;  %907 = vmatprep.subr.bf16.mxu1 %v993_v2  ;;  %v998_v7 = vld [vmem:[%s1295_s19 + $0x8] sm:$0xff]   ;;  %v1002_v11 = vld [vmem:[%s1295_s19 + $0x10] sm:$0xff]   ;;  %v362_v37 = vshrl.u32 %v361_v31, 7  ;;  %v657_v58 = vand.u32 (!%p876_p7), 127, %v361_v31 }
  0x3f   : > { %v995_v4 = vld [vmem:[%s1295_s19 + $0x80] sm:$0xff]   ;;  %886 = vmatpush3.bf16.msra.mxu0 %v994_v3  ;;  %v999_v8 = vld [vmem:[%s1295_s19 + $0x88] sm:$0xff]   ;;  %v1003_v12 = vld [vmem:[%s1295_s19 + $0x90] sm:$0xff]   ;;  %v360_v39 = vunpack.c.0.s8 %v359_v36 }
  0x40   : > { %908 = vmatpush3.bf16.msra.mxu1 %v995_v4  ;;  %887 = vmatprep.subr.bf16.mxu0 %v996_v5  ;;  %v1004_v13 = vld [vmem:[%s1295_s19 + $0x58] sm:$0xff]   ;;  %v1008_v17 = vld [vmem:[%s1295_s19 + $0x60] sm:$0xff]   ;;  %v1012_v21 = vld [vmem:[%s1295_s19 + $0x68] sm:$0xff]   ;;  %vm658_vm0 = vcmp.lt.s32.totalorder (!%p876_p7), %v657_v58, 10 }
  0x41   : > { %909 = vmatprep.subr.bf16.mxu1 %v997_v6  ;;  %v1005_v14 = vld [vmem:[%s1295_s19 + $0xd8] sm:$0xff]   ;;  %v1009_v18 = vld [vmem:[%s1295_s19 + $0xe0] sm:$0xff]   ;;  %v1013_v22 = vld [vmem:[%s1295_s19 + $0xe8] sm:$0xff]   ;;  %v363_v40 = vsub.s32 %v360_v39, %v362_v37  ;;  %v1170_v6 = vmov (!%p876_p7), 0  }
  0x42   : > { %v1006_v15 = vld [vmem:[%s1295_s19 + $0x18] sm:$0xff]   ;;  %v1010_v19 = vld [vmem:[%s1295_s19 + $0x20] sm:$0xff]   ;;  %v1014_v23 = vld [vmem:[%s1295_s19 + $0x28] sm:$0xff]   ;;  %1024 = vset.pattern.permute.xlu0 (!%p876_p7), %v1170_v6 }
  0x43   : > { %888 = vmatpush3.bf16.msra.mxu0 %v998_v7  ;;  %v1007_v16 = vld [vmem:[%s1295_s19 + $0x98] sm:$0xff]   ;;  %v1011_v20 = vld [vmem:[%s1295_s19 + $0xa0] sm:$0xff]   ;;  %v1015_v24 = vld [vmem:[%s1295_s19 + $0xa8] sm:$0xff]  }
  0x44   : > { %910 = vmatpush3.bf16.msra.mxu1 %v999_v8  ;;  %889 = vmatprep.subr.bf16.mxu0 %v1000_v9  ;;  %v1016_v25 = vld [vmem:[%s1295_s19 + $0x70] sm:$0xff]   ;;  %v1020_v29 = vld [vmem:[%s1295_s19 + $0x78] sm:$0xff]   ;;  %v700_v60 = vld [vmem:[%s1424_s2] sm:$0x3] (!%p876_p7) }
  0x45   : > { %911 = vmatprep.subr.bf16.mxu1 %v1001_v10  ;;  %v1017_v26 = vld [vmem:[%s1295_s19 + $0xf0] sm:$0xff]   ;;  %v1021_v30 = vld [vmem:[%s1295_s19 + $0xf8] sm:$0xff]   ;;  %v659_v61 = vld [vmem:[%s1423_s1] sm:$0x3] (!%p876_p7)  ;;  %v701_v63 = vsel (!%p876_p7), %vm658_vm0, %v700_v60, -1e+30 }
  0x46   : > { %v1018_v27 = vld [vmem:[%s1295_s19 + $0x30] sm:$0xff]   ;;  %v1022_v32 = vld [vmem:[%s1295_s19 + $0x38] sm:$0xff]   ;;  %v702_v1 = vmul.f32 (!%p876_p7), 0.5, %v701_v63  ;;  %v660_v2 = vsel (!%p876_p7), %vm658_vm0, %v659_v61, -1e+30 }
  0x47   : > { %890 = vmatpush3.bf16.msra.mxu0 %v1002_v11  ;;  %v1019_v28 = vld [vmem:[%s1295_s19 + $0xb0] sm:$0xff]   ;;  %v1023_v33 = vld [vmem:[%s1295_s19 + $0xb8] sm:$0xff]   ;;  %v662_v5 = vsel (!%p876_p7), %vm661_vm1, %v660_v2, -inf }
  0x48   : > { %912 = vmatpush3.bf16.msra.mxu1 %v1003_v12  ;;  %891 = vmatprep.subr.bf16.mxu0 %v1004_v13  ;;  %v843_v34 = vld.sshfl [vmem:[%s274_s14] sm:$0x33 pattern:$0x75316420]  ;;  %v283_v54 = vld [vmem:[#allocation2] sm:$0x3] }
  0x49   : > { %913 = vmatprep.subr.bf16.mxu1 %v1005_v14  ;;  %v357_v38 = vcombine.high %v843_v34, %v843_v34  ;;  %v364_v42 = vrot.slane %v843_v34, %v363_v40  ;;  %v703_v4 = vsel (!%p876_p7), %vm661_vm1, %v702_v1, -inf  ;;  %v1171_v34 = vmov (!%p876_p7), 0.0  }
  0x4a   : > { %704 = vmax.xlane.f32.xlu1 (!%p876_p7), %v703_v4 }
  0x4b   : > { %892 = vmatpush3.bf16.msra.mxu0 %v1006_v15  ;;  %v371_v41 = vrot.slane %v357_v38, %v363_v40  ;;  %v372_v44 = vcombine.high %v364_v42, %v364_v42 }
  0x4c   : > { %914 = vmatpush3.bf16.msra.mxu1 %v1007_v16  ;;  %893 = vmatprep.subr.bf16.mxu0 %v1008_v17 }
  0x4d   : > { %915 = vmatprep.subr.bf16.mxu1 %v1009_v18  ;;  %602 = vmatprep.mubr.bf16.mxu0 %v371_v41  ;;  %v373_v43 = vcombine.high %v371_v41, %v371_v41 }
  0x4f   : > { %894 = vmatpush3.bf16.msra.mxu0 %v1010_v19  ;;  %642 = vmatprep.mubr.bf16.mxu1 %v373_v43 }
  0x50   : > { %916 = vmatpush3.bf16.msra.mxu1 %v1011_v20  ;;  %895 = vmatprep.subr.bf16.mxu0 %v1012_v21 }
  0x51   : > { %917 = vmatprep.subr.bf16.mxu1 %v1013_v22  ;;  %v674_v22 = vld [vmem:[%s1422_s0] sm:$0x3] (!%p876_p7) }
  0x53   : > { %896 = vmatpush3.bf16.msra.mxu0 %v1014_v23 }
  0x54   : > { %918 = vmatpush3.bf16.msra.mxu1 %v1015_v24  ;;  %897 = vmatprep.subr.bf16.mxu0 %v1016_v25 }
  0x55   : > { %919 = vmatprep.subr.bf16.mxu1 %v1017_v26 }
  0x57   : > { %898 = vmatpush3.bf16.msra.mxu0 %v1018_v27 }
  0x58   : > { %920 = vmatpush3.bf16.msra.mxu1 %v1019_v28  ;;  %899 = vmatprep.subr.bf16.mxu0 %v1020_v29 }
  0x59   : > { %921 = vmatprep.subr.bf16.mxu1 %v1021_v30 }
  0x5b   : > { %900 = vmatpush3.bf16.msra.mxu0 %v1022_v32 }
  0x5c   : > { %922 = vmatpush3.bf16.msra.mxu1 %v1023_v33 }
  0x5e   : > { %603 = vmatmul.mubr.bf16.vlgmr.msra.gmra.mrb[0].mxu0 %v364_v42 }
  0x5f   : > { %643 = vmatmul.mubr.bf16.vlgmr.msra.gmra.mrb[0].mxu1 %v372_v44 }
  0xd7   : > { %v705_v8 = vpop.xlane.xlu1 (!%p876_p7), %704 }
  0xd8   : > { %v706_v10 = vsub.f32 (!%p876_p7), %v702_v1, %v705_v8 }
  0xda   : > { %v707_v12 = vmul.f32 (!%p876_p7), 1.442695, %v706_v10 }
 0x131   : > { %v901_v45 = vpop.f32.mrb[0].mxu0 }
 0x132   : > { %v902_v46 = vpop.f32.mrb[1].mxu0  ;;  %v923_v47 = vpop.f32.mrb[0].mxu1 }
 0x133   : > { %v903_v48 = vadd.f32 %v902_v46, %v901_v45  ;;  %v904_v49 = vpop.f32.mrb[2].mxu0  ;;  %v924_v50 = vpop.f32.mrb[1].mxu1 }
 0x134   : > { %v905_v51 = vpop.f32.mrb[3].mxu0  ;;  %v925_v52 = vadd.f32 %v924_v50, %v923_v47  ;;  %v926_v53 = vpop.f32.mrb[2].mxu1  ;;  %655 = sbr.rel (%p876_p7) target bundleno = 865 (0x361), region = 52 }
 0x135   : > { %v927_v55 = vpop.f32.mrb[3].mxu1 }
 0x136   : > { %v645_v56 = vadd.f32 %v925_v52, %v903_v48 }
 0x138   : > { %v650_v57 = vadd.f32 %v645_v56, %v283_v54 }
 0x13a   : > { %651 = vst [vmem:[#allocation2] sm:$0x3] %v650_v57 }
 0x141   : > { %v698_v59 = vld [vmem:[#allocation2] sm:$0x3] }
 0x142   : > { %v699_v62 = vsel %vm658_vm0, %v698_v59, -1e+30 }
 0x143   : > { %v715_v0 = vmul.f32 0.5, %v699_v62 }
 0x145   : > { %v716_v3 = vsel %vm661_vm1, %v715_v0, -inf }
 0x146   : > { %717 = vmax.xlane.f32.xlu0 %v716_v3 }
 0x14a   : > { %663 = vmax.xlane.f32.xlu0 %v662_v5 }
 0x1d3   : > { %v718_v7 = vpop.xlane.xlu0 %717 }
 0x1d4   : > { %v719_v9 = vsub.f32 %v715_v0, %v718_v7 }
 0x1d6   : > { %v720_v11 = vmul.f32 1.442695, %v719_v9 }
 0x1d7   : > { %v664_v13 = vpop.xlane.xlu0 %663 }
 0x1d8   : > { %1025 = vpow2.f32 %v720_v11  ;;  %v665_v14 = vsub.f32 %v660_v2, %v664_v13 }
 0x1d9   : > { %1027 = vpow2.f32 %v707_v12 }
 0x1da   : > { %v666_v15 = vmul.f32 1.442695, %v665_v14 }
 0x1dc   : > { %1029 = vpow2.f32 %v666_v15 }
 0x1e2   : > { %v1026_v16 = vpop.eup %1025 }
 0x1e3   : > { %v1028_v17 = vpop.eup %1027  ;;  %v722_v18 = vsel %vm661_vm1, %v1026_v16, 0.0 }
 0x1e4   : > { %723 = vadd.xlane.f32.xlu1 %v722_v18  ;;  %v709_v19 = vsel %vm661_vm1, %v1028_v17, 0.0 }
 0x1e6   : > { %v1030_v20 = vpop.eup %1029 }
 0x1e7   : > { %v668_v21 = vsel %vm661_vm1, %v1030_v20, 0.0 }
 0x1e8   : > { %710 = vadd.xlane.f32.xlu1 %v709_v19  ;;  %669 = vadd.xlane.f32.xlu0 %v668_v21 }
 0x1fe   : > { %676 = vperm.xlu0 %1024, %v674_v22  }
 0x271   : > { %v724_v23 = vpop.xlane.xlu1 %723 }
 0x272   : > { %1031 = vlog2.f32 %v724_v23 }
 0x275   : > { %v711_v24 = vpop.xlane.xlu1 %710  ;;  %v670_v25 = vpop.xlane.xlu0 %669 }
 0x276   : > { %1033 = vlog2.f32 %v711_v24 }
 0x277   : > { %1035 = vlog2.f32 %v670_v25 }
 0x27c   : > { %v1032_v26 = vpop.eup %1031 }
 0x27d   : > { %v726_v27 = vmul.f32 0.6931472, %v1032_v26  ;;  %v677_v28 = vpop.permute.xlu0 %676 }
 0x27e   : > { %vm678_vm2 = vcmp.eq.s32.totalorder %v657_v58, %v677_v28 }
 0x27f   : > { %v727_v29 = vsub.f32 %v719_v9, %v726_v27  ;;  %v877_v35 = vsel %vm678_vm2, 1.0, %v1171_v34 }
 0x280   : > { %v1034_v30 = vpop.eup %1033 }
 0x281   : > { %v1036_v31 = vpop.eup %1035  ;;  %v728_v32 = vmul.f32 1.442695, %v727_v29  ;;  %v713_v36 = vmul.f32 0.6931472, %v1034_v30 }
 0x282   : > { %v672_v33 = vmul.f32 0.6931472, %v1036_v31 }
 0x283   : > { %1037 = vpow2.f32 %v728_v32  ;;  %v714_v39 = vsub.f32 %v706_v10, %v713_v36 }
 0x284   : > { %v673_v37 = vsub.f32 %v665_v14, %v672_v33 }
 0x285   : > { %v730_v41 = vsub.f32 %v727_v29, %v714_v39 }
 0x286   : > { %v681_v38 = vmul.f32 %v877_v35, %v673_v37 }
 0x288   : > { %v682_v40 = vsel %vm661_vm1, %v681_v38, 0.0 }
 0x289   : > { %683 = vadd.xlane.f32.xlu1 %v682_v40 }
 0x28d   : > { %v1038_v42 = vpop.eup %1037 }
 0x28e   : > { %v731_v43 = vmul.f32 %v1038_v42, %v730_v41 }
 0x290   : > { %v732_v44 = vsel %vm661_vm1, %v731_v43, 0.0 }
 0x291   : > { %733 = vadd.xlane.f32.xlu1 %v732_v44 }
 0x316   : > { %v684_v45 = vpop.xlane.xlu1 %683 }
 0x317   : > { %v685_v46 = vrot.slane %v684_v45, 4 }
 0x319   : > { %v686_v47 = vadd.f32 %v685_v46, %v684_v45 }
 0x31b   : > { %v687_v48 = vrot.slane %v686_v47, 2 }
 0x31d   : > { %v688_v49 = vadd.f32 %v687_v48, %v686_v47 }
 0x31e   : > { %v734_v50 = vpop.xlane.xlu1 %733 }
 0x31f   : > { %v735_v51 = vrot.slane %v734_v50, 4  ;;  %v689_v52 = vrot.slane %v688_v49, 1 }
 0x321   : > { %v736_v53 = vadd.f32 %v735_v51, %v734_v50  ;;  %v690_v54 = vadd.f32 %v689_v52, %v688_v49 }
 0x323   : > { %v737_v55 = vrot.slane %v736_v53, 2  ;;  %929 = vpush %v690_v54 }
 0x325   : > { %v738_v56 = vadd.f32 %v737_v55, %v736_v53 }
 0x327   : > { %v739_v57 = vrot.slane %v738_v56, 1 }
 0x329   : > { %v740_v58 = vadd.f32 %v739_v57, %v738_v56 }
 0x32b   : > { %931 = vpush %v740_v58 }
 0x354   : > { %s930_s9 = spop %929 }
 0x355   : > { %v692_v59 = vstv %s930_s9 }
 0x356   : > { %v693_v60 = vsub.f32 0.0, %v692_v59 }
 0x358   : > { %v695_v61 = vmul.f32 0.5, %v693_v60 }
 0x35a   : > { %697 = vst.msk [vmem:[#allocation6] sm:$0x1] %vm696_vm3, %v695_v61 }
 0x35c   : > { %s932_s10 = spop %931 }
 0x35d   : > { %v742_v62 = vstv %s932_s10 }
 0x35e   : > { %v743_v63 = vmul.f32 2.0, %v742_v62 }
 0x360   : > { %744 = vst.msk [vmem:[#allocation7] sm:$0x1] %vm696_vm3, %v743_v63 }
 0x361 PF: > { %p948_p4 = scmp.eq.s32.totalorder %s1228_s25, 1  ;;  %s1172_s11 = smov [#allocation6]  }
 0x362   : > { %s752_s13 = sshll.u32 %s1172_s11, 4  ;;  %s1173_s17 = smov [#allocation7]   ;;  %s753_s13 = int_to_ptr.vmem [resolvable:$true] %s752_s13 }
 0x363   : > { %s763_s18 = sshll.u32 %s1173_s17, 4  ;;  %s1069_s19 = scalar_lea.vmem %s753_s13, 16  ;;  %s764_s18 = int_to_ptr.vmem [resolvable:$true] %s763_s18 }
 0x364   : > { %p1070_p5 = scmp.ne.s32.totalorder %s753_s13, %s1069_s19  ;;  %s1075_s20 = scalar_lea.vmem %s753_s13, 32 }
 0x365   : > { %p1076_p12 = scmp.lt.s32.totalorder %s753_s13, %s753_s13  ;;  %p1077_p0 = scmp.lt.s32.totalorder %s1075_s20, %s1069_s19 }
 0x366   : > { %p1071_p6 = pnand %p1070_p5, %p948_p4 }
 0x367   : > { %p1078_p1 = por %p1077_p0, %p1076_p12 }
 0x368   : > { %p1072_p10 = pneg %p1071_p6 }
 0x36a   : > { %p1079_p2 = pnand %p1078_p1, %p1072_p10 }
 0x36c   : > { %1082 = shalt.err (!%p1079_p2)
}
 0x36d   : > { %s1083_s14 = scalar_lea.hbm %s1427_s5, 16 }
 0x36e   : > { %p1084_p11 = scmp.ne.s32.totalorder %s1427_s5, %s1083_s14  ;;  %p1089_p9 = scmp.lt.u32.totalorder %s1083_s14, %s1427_s5 }
 0x370   : > { %p1085_p13 = pnand %p1084_p11, %p948_p4 }
 0x372   : > { %p1086_p3 = pneg %p1085_p13 }
 0x374   : > { %p1091_p8 = pnand %p1089_p9, %p1086_p3 }
 0x376   : > { %1094 = shalt.err (!%p1091_p8)
}
 0x377   : > { %936 = dma.vmem_to_hbm [thread:$0]  (%p948_p4), %s753_s13, 16, %s1427_s5, [#allocation5]  }
 0x378   : > { %s1095_s7 = scalar_lea.vmem %s764_s18, 16  ;;  %s1101_s8 = scalar_lea.vmem %s764_s18, 32 }
 0x379   : > { %p1096_p7 = scmp.ne.s32.totalorder %s764_s18, %s1095_s7  ;;  %p1102_p10 = scmp.lt.s32.totalorder %s764_s18, %s764_s18 }
 0x37a   : > { %p1103_p12 = scmp.lt.s32.totalorder %s1101_s8, %s1095_s7 }
 0x37b   : > { %p1097_p5 = pnand %p1096_p7, %p948_p4 }
 0x37c   : > { %p1104_p0 = por %p1103_p12, %p1102_p10 }
 0x37d   : > { %p1098_p6 = pneg %p1097_p5 }
 0x37f   : > { %p1105_p1 = pnand %p1104_p0, %p1098_p6 }
 0x381   : > { %1108 = shalt.err (!%p1105_p1)
}
 0x382   : > { %s1109_s11 = scalar_lea.hbm %s1428_s6, 16 }
 0x383   : > { %p1110_p2 = scmp.ne.s32.totalorder %s1428_s6, %s1109_s11  ;;  %p1115_p3 = scmp.lt.u32.totalorder %s1109_s11, %s1428_s6 }
 0x385   : > { %p1111_p11 = pnand %p1110_p2, %p948_p4 }
 0x387   : > { %p1112_p13 = pneg %p1111_p11 }
 0x389   : > { %p1117_p9 = pnand %p1115_p3, %p1112_p13 }
 0x38b   : > { %1120 = shalt.err (!%p1117_p9)
}
 0x38c   : > { %938 = dma.vmem_to_hbm [thread:$0]  (%p948_p4), %s764_s18, 16, %s1428_s6, [#allocation8]  }
 0x38d   : > { %1142 = dma.done.wait (%p948_p4), [#allocation5], 16  }
 0x38e   : > { %1144 = vsyncadd (%p948_p4), [#allocation5], 4294967280 }
 0x38f   : > { %1146 = dma.done.wait (%p948_p4), [#allocation8], 16  }
 0x390   : > { %1148 = vsyncadd (%p948_p4), [#allocation8], 4294967280 }
 0x391 PF: > { %p19_p8 = scmp.ge.s32.totalorder %s1231_s26, 4   ;;  %s1432_s21 = smov %s1155_s22 }
 0x392   : > { %s1433_s22 = smov %s1159_s23  ;;  %s1434_s23 = smov %s1241_s29 }
 0x393   : > { %s1435_s24 = smov %s1231_s26  ;;  %21 = sbr.rel (!%p19_p8) target bundleno = 5 (0x5), region = 96 }
 0x39a   :  { %780 = vsyncpa [#allocation4], 1 }
 0x39b   :  { %782 = vsyncpa [#allocation4 + $0x1], 1 }
 0x39c   :  { %783 = vsyncpa [#allocation5], 1 }
 0x39d   :  { %785 = vsyncpa [#allocation5 + $0x1], 1 }
 0x39e   :  { %786 = vsyncpa [#allocation8], 1 }

</bundles_post_ra>
